<compile_context>
chip_gen: v7x
topology: tpu7x:2x2x1
jax: 0.10.0
libtpu: 0.0.40
codegen_flags: <defaults>
</compile_context>

<pallas_src>
import jax
import jax.numpy as jnp
from jax import lax
from jax.experimental import pallas as pl
from jax.experimental.pallas import tpu as pltpu


_LANE = 128
_EPS = 1e-6  # F.pairwise_distance default eps (added to the difference)


def _sublane_multiple(dtype) -> int:
    itemsize = jnp.dtype(dtype).itemsize
    return {4: 8, 2: 16, 1: 32}.get(itemsize, 8)


def _round_up(x: int, m: int) -> int:
    return ((x + m - 1) // m) * m


def _choose_tiles(N: int, D: int, itemsize: int, sublane: int):
    """Pick (tile_b, tile_d, d_padded).

    Per-step working set is accounted conservatively as:
      3 inputs x 2 DMA buffers (native dtype)  +  ~5 f32 intermediates
    against a ~10 MiB block budget (HBM-streaming kernels hit ~85% of
    roofline at 0.5-2 MiB blocks; bigger tiles only add VMEM pressure,
    which is binding on v7x's 64 MiB/TC).
    """
    BLOCK_BUDGET = 10 << 20
    per_elem = 3 * 2 * itemsize + 5 * 4

    # D (lane) tiling: keep full D if a minimal (sublane x D) tile fits,
    # otherwise chunk D in multiples of 128 and accumulate in-kernel.
    if sublane * D * per_elem <= BLOCK_BUDGET:
        tile_d = D
    else:
        tile_d = max(_LANE, ((BLOCK_BUDGET // (sublane * per_elem)) // _LANE) * _LANE)
    d_padded = D if tile_d == D else _round_up(D, tile_d)

    # Batch (sublane) tiling against what the D chunk leaves of the budget.
    tile_b = max(sublane, ((BLOCK_BUDGET // (tile_d * per_elem)) // sublane) * sublane)

    n_padded = _round_up(N, sublane)

    # Keep >= 4 batch grid steps for non-tiny problems: pipeline depth for
    # DMA/compute overlap everywhere, and lets v7x shard the parallel axis
    # across both TensorCores.  Tiny problems may still collapse to one step.
    total_input_bytes = 3 * N * D * itemsize
    if total_input_bytes > (4 << 20):
        cap = max(sublane, ((n_padded // 4) // sublane) * sublane)
        tile_b = min(tile_b, cap)

    tile_b = min(tile_b, n_padded)
    return tile_b, tile_d, d_padded


def _make_kernel(margin: float, D: int, tile_d: int, d_is_padded: bool):
    margin = float(margin)

    def kernel(a_ref, p_ref, n_ref, out_ref, pos_acc, neg_acc):
        k = pl.program_id(1)

        a = a_ref[...].astype(jnp.float32)
        p = p_ref[...].astype(jnp.float32)
        n = n_ref[...].astype(jnp.float32)

        dpos = a - p + _EPS
        dneg = a - n + _EPS

        if d_is_padded:
            # Zero padded D columns so they don't contribute eps^2 terms.
            col = lax.broadcasted_iota(jnp.int32, a.shape, 1) + k * tile_d
            valid = col < D
            dpos = jnp.where(valid, dpos, 0.0)
            dneg = jnp.where(valid, dneg, 0.0)

        pos_sq = jnp.sum(dpos * dpos, axis=-1, keepdims=True)  # (tile_b, 1)
        neg_sq = jnp.sum(dneg * dneg, axis=-1, keepdims=True)

        @pl.when(k == 0)
        def _():
            pos_acc[...] = jnp.zeros_like(pos_acc)
            neg_acc[...] = jnp.zeros_like(neg_acc)

        pos_acc[...] += pos_sq
        neg_acc[...] += neg_sq

        @pl.when(k == pl.num_programs(1) - 1)
        def _():
            hinge = jnp.sqrt(pos_acc[...]) - jnp.sqrt(neg_acc[...]) + margin
            out_ref[...] = jnp.maximum(hinge, 0.0)

    return kernel


def triplet_loss(anchor, positive, negative, margin: float = 0.5,
                 tile_b: int | None = None, tile_d: int | None = None):
    """anchor/positive/negative: (N, D). Returns scalar f32 mean triplet loss."""
    N, D = anchor.shape
    assert positive.shape == (N, D) and negative.shape == (N, D)

    itemsize = jnp.dtype(anchor.dtype).itemsize
    sublane = _sublane_multiple(anchor.dtype)

    auto_b, auto_d, auto_d_pad = _choose_tiles(N, D, itemsize, sublane)
    if tile_b is None:
        tile_b = auto_b
    if tile_d is None:
        tile_d, d_padded = auto_d, auto_d_pad
    else:
        d_padded = D if tile_d == D else _round_up(D, tile_d)

    n_padded = _round_up(N, tile_b)

    def _pad(x):
        if n_padded == N and d_padded == D:
            return x
        return jnp.pad(x, ((0, n_padded - N), (0, d_padded - D)))

    a, p, n = _pad(anchor), _pad(positive), _pad(negative)

    grid = (n_padded // tile_b, d_padded // tile_d)  # reduction (D) axis last
    kernel = _make_kernel(margin, D, tile_d, d_padded != D)

    in_spec = pl.BlockSpec((tile_b, tile_d), lambda i, k: (i, k))
    out_spec = pl.BlockSpec((tile_b, 1), lambda i, k: (i, 0))

    # Derive the scoped-VMEM limit from the chip (binding case is v7x: 64 MiB
    # per TensorCore); fall back to the v7x worst case if the query fails.
    try:
        vmem_cap = int(pltpu.get_tpu_info().vmem_capacity_bytes)
    except Exception:
        vmem_cap = 64 << 20
    vmem_limit = int(min(vmem_cap // 2, 32 << 20))

    cost = pl.CostEstimate(
        flops=10 * N * D,
        transcendentals=2 * N,
        bytes_accessed=3 * N * D * itemsize + N * 4,
    )

    per_row_hinge = pl.pallas_call(
        kernel,
        out_shape=jax.ShapeDtypeStruct((n_padded, 1), jnp.float32),
        grid_spec=pltpu.PrefetchScalarGridSpec(
            num_scalar_prefetch=0,
            grid=grid,
            in_specs=[in_spec, in_spec, in_spec],
            out_specs=out_spec,
            scratch_shapes=[pltpu.VMEM((tile_b, 1), jnp.float32),
                            pltpu.VMEM((tile_b, 1), jnp.float32)],
        ),
        compiler_params=pltpu.CompilerParams(
            dimension_semantics=("parallel", "arbitrary"),
            vmem_limit_bytes=vmem_limit,
        ),
        cost_estimate=cost,
    )(a, p, n)

    # Tiny final reduce over the valid rows, done in the wrapper.
    return jnp.mean(per_row_hinge[:N, 0])


def triplet_loss_ref(anchor, positive, negative, margin=0.5):
    a = anchor.astype(jnp.float32)
    p = positive.astype(jnp.float32)
    n = negative.astype(jnp.float32)
    pos_d = jnp.sqrt(jnp.sum((a - p + _EPS) ** 2, axis=-1))
    neg_d = jnp.sqrt(jnp.sum((a - n + _EPS) ** 2, axis=-1))
    return jnp.mean(jnp.maximum(pos_d - neg_d + margin, 0.0))


if __name__ == "__main__":
    key = jax.random.PRNGKey(0)
    k1, k2, k3 = jax.random.split(key, 3)

    # Small embedding batch, auto tiling (full-D path, single grid step).
    N, D = 16, 32
    anchor = jax.random.normal(k1, (N, D), dtype=jnp.float32)
    positive = jax.random.normal(k2, (N, D), dtype=jnp.float32)
    negative = jax.random.normal(k3, (N, D), dtype=jnp.float32)

    out = jax.block_until_ready(triplet_loss(anchor, positive, negative, margin=0.5))
    ref = triplet_loss_ref(anchor, positive, negative, margin=0.5)
    assert jnp.allclose(out, ref, atol=1e-5, rtol=1e-5), (out, ref)

    # Second small check exercising the D-chunked accumulation + ragged-D
    # masking path (explicit tiles, grid=(3, 2)).
    N2, D2 = 24, 160
    a2 = jax.random.normal(k1, (N2, D2), dtype=jnp.float32)
    p2 = jax.random.normal(k2, (N2, D2), dtype=jnp.float32)
    n2 = jax.random.normal(k3, (N2, D2), dtype=jnp.float32)
    out2 = jax.block_until_ready(
        triplet_loss(a2, p2, n2, margin=0.5, tile_b=8, tile_d=128))
    ref2 = triplet_loss_ref(a2, p2, n2, margin=0.5)
    assert jnp.allclose(out2, ref2, atol=1e-5, rtol=1e-5), (out2, ref2)

    print("KERNEL_OK")
</pallas_src>

<mosaic_0001>
module attributes {stable_mosaic.version = 11 : i64} {
  func.func @kernel(%arg0: i32, %arg1: i32, %arg2: memref<16x32xf32, #tpu.memory_space<vmem>>, %arg3: memref<16x32xf32, #tpu.memory_space<vmem>>, %arg4: memref<16x32xf32, #tpu.memory_space<vmem>>, %arg5: memref<16x1xf32, #tpu.memory_space<vmem>>, %arg6: memref<16x1xf32, #tpu.memory_space<vmem>>, %arg7: memref<16x1xf32, #tpu.memory_space<vmem>>) attributes {dimension_semantics = [#tpu.dimension_semantics<parallel>, #tpu.dimension_semantics<arbitrary>], iteration_bounds = array<i64: 1, 1>, scalar_prefetch = 0 : i64, scratch_operands = 2 : i64, tpu.core_type = #tpu.core_type<tc>, window_params = [{transform_indices = @transform_0, window_bounds = array<i64: 16, 32>}, {transform_indices = @transform_1, window_bounds = array<i64: 16, 32>}, {transform_indices = @transform_2, window_bounds = array<i64: 16, 32>}, {transform_indices = @transform_3, window_bounds = array<i64: 16, 1>}]} {
    %c0 = arith.constant 0 : index
    %c0_0 = arith.constant 0 : index
    %0 = vector.load %arg2[%c0, %c0_0] : memref<16x32xf32, #tpu.memory_space<vmem>>, vector<16x32xf32>
    %c0_1 = arith.constant 0 : index
    %c0_2 = arith.constant 0 : index
    %1 = vector.load %arg3[%c0_1, %c0_2] : memref<16x32xf32, #tpu.memory_space<vmem>>, vector<16x32xf32>
    %c0_3 = arith.constant 0 : index
    %c0_4 = arith.constant 0 : index
    %2 = vector.load %arg4[%c0_3, %c0_4] : memref<16x32xf32, #tpu.memory_space<vmem>>, vector<16x32xf32>
    %3 = arith.subf %0, %1 : vector<16x32xf32>
    %cst = arith.constant 9.99999997E-7 : f32
    %4 = vector.broadcast %cst : f32 to vector<16x32xf32>
    %5 = arith.addf %3, %4 : vector<16x32xf32>
    %6 = arith.subf %0, %2 : vector<16x32xf32>
    %cst_5 = arith.constant 9.99999997E-7 : f32
    %7 = vector.broadcast %cst_5 : f32 to vector<16x32xf32>
    %8 = arith.addf %6, %7 : vector<16x32xf32>
    %9 = arith.mulf %5, %5 : vector<16x32xf32>
    %cst_6 = arith.constant dense<0.000000e+00> : vector<16xf32>
    %10 = vector.multi_reduction <add>, %9, %cst_6 [1] : vector<16x32xf32> to vector<16xf32>
    %11 = vector.shape_cast %10 : vector<16xf32> to vector<16x1xf32>
    %12 = arith.mulf %8, %8 : vector<16x32xf32>
    %cst_7 = arith.constant dense<0.000000e+00> : vector<16xf32>
    %13 = vector.multi_reduction <add>, %12, %cst_7 [1] : vector<16x32xf32> to vector<16xf32>
    %14 = vector.shape_cast %13 : vector<16xf32> to vector<16x1xf32>
    %c0_i32 = arith.constant 0 : i32
    %15 = arith.cmpi eq, %arg1, %c0_i32 : i32
    %16 = arith.extui %15 : i1 to i32
    %c0_i32_8 = arith.constant 0 : i32
    %17 = arith.cmpi ne, %16, %c0_i32_8 : i32
    scf.if %17 {
      %cst_19 = arith.constant 0.000000e+00 : f32
      %27 = vector.broadcast %cst_19 : f32 to vector<16x1xf32>
      %c0_20 = arith.constant 0 : index
      %c0_21 = arith.constant 0 : index
      %28 = vector.load %arg6[%c0_20, %c0_21] : memref<16x1xf32, #tpu.memory_space<vmem>>, vector<16x1xf32>
      tpu.vector_store %arg6[%c0_20, %c0_21], %27 {strides = array<i32>} : memref<16x1xf32, #tpu.memory_space<vmem>>, vector<16x1xf32>,
      %cst_22 = arith.constant 0.000000e+00 : f32
      %29 = vector.broadcast %cst_22 : f32 to vector<16x1xf32>
      %c0_23 = arith.constant 0 : index
      %c0_24 = arith.constant 0 : index
      %30 = vector.load %arg7[%c0_23, %c0_24] : memref<16x1xf32, #tpu.memory_space<vmem>>, vector<16x1xf32>
      tpu.vector_store %arg7[%c0_23, %c0_24], %29 {strides = array<i32>} : memref<16x1xf32, #tpu.memory_space<vmem>>, vector<16x1xf32>,
    } else {
    }
    %c0_9 = arith.constant 0 : index
    %c0_10 = arith.constant 0 : index
    %18 = vector.load %arg6[%c0_9, %c0_10] : memref<16x1xf32, #tpu.memory_space<vmem>>, vector<16x1xf32>
    %19 = arith.addf %18, %11 : vector<16x1xf32>
    %c0_11 = arith.constant 0 : index
    %c0_12 = arith.constant 0 : index
    %20 = vector.load %arg6[%c0_11, %c0_12] : memref<16x1xf32, #tpu.memory_space<vmem>>, vector<16x1xf32>
    tpu.vector_store %arg6[%c0_11, %c0_12], %19 {strides = array<i32>} : memref<16x1xf32, #tpu.memory_space<vmem>>, vector<16x1xf32>,
    %c0_13 = arith.constant 0 : index
    %c0_14 = arith.constant 0 : index
    %21 = vector.load %arg7[%c0_13, %c0_14] : memref<16x1xf32, #tpu.memory_space<vmem>>, vector<16x1xf32>
    %22 = arith.addf %21, %14 : vector<16x1xf32>
    %c0_15 = arith.constant 0 : index
    %c0_16 = arith.constant 0 : index
    %23 = vector.load %arg7[%c0_15, %c0_16] : memref<16x1xf32, #tpu.memory_space<vmem>>, vector<16x1xf32>
    tpu.vector_store %arg7[%c0_15, %c0_16], %22 {strides = array<i32>} : memref<16x1xf32, #tpu.memory_space<vmem>>, vector<16x1xf32>,
    %c0_i32_17 = arith.constant 0 : i32
    %24 = arith.cmpi eq, %arg1, %c0_i32_17 : i32
    %25 = arith.extui %24 : i1 to i32
    %c0_i32_18 = arith.constant 0 : i32
    %26 = arith.cmpi ne, %25, %c0_i32_18 : i32
    scf.if %26 {
      %c0_19 = arith.constant 0 : index
      %c0_20 = arith.constant 0 : index
      %27 = vector.load %arg6[%c0_19, %c0_20] : memref<16x1xf32, #tpu.memory_space<vmem>>, vector<16x1xf32>
      %28 = math.sqrt %27 : vector<16x1xf32>
      %c0_21 = arith.constant 0 : index
      %c0_22 = arith.constant 0 : index
      %29 = vector.load %arg7[%c0_21, %c0_22] : memref<16x1xf32, #tpu.memory_space<vmem>>, vector<16x1xf32>
      %30 = math.sqrt %29 : vector<16x1xf32>
      %31 = arith.subf %28, %30 : vector<16x1xf32>
      %cst_23 = arith.constant 5.000000e-01 : f32
      %32 = vector.broadcast %cst_23 : f32 to vector<16x1xf32>
      %33 = arith.addf %31, %32 : vector<16x1xf32>
      %cst_24 = arith.constant 0.000000e+00 : f32
      %34 = vector.broadcast %cst_24 : f32 to vector<16x1xf32>
      %35 = arith.maximumf %33, %34 : vector<16x1xf32>
      %c0_25 = arith.constant 0 : index
      %c0_26 = arith.constant 0 : index
      %36 = vector.load %arg5[%c0_25, %c0_26] : memref<16x1xf32, #tpu.memory_space<vmem>>, vector<16x1xf32>
      tpu.vector_store %arg5[%c0_25, %c0_26], %35 {strides = array<i32>} : memref<16x1xf32, #tpu.memory_space<vmem>>, vector<16x1xf32>,
    } else {
    }
    return
  }
  func.func @transform_0(%arg0: i32, %arg1: i32) -> (i32, i32) {
    %c0_i32 = arith.constant 0 : i32
    return %arg0, %arg1 : i32, i32
  }
  func.func @transform_1(%arg0: i32, %arg1: i32) -> (i32, i32) {
    %c0_i32 = arith.constant 0 : i32
    return %arg0, %arg1 : i32, i32
  }
  func.func @transform_2(%arg0: i32, %arg1: i32) -> (i32, i32) {
    %c0_i32 = arith.constant 0 : i32
    return %arg0, %arg1 : i32, i32
  }
  func.func @transform_3(%arg0: i32, %arg1: i32) -> (i32, i32) {
    %c0_i32 = arith.constant 0 : i32
    %c0_i32_0 = arith.constant 0 : i32
    return %arg0, %c0_i32 : i32, i32
  }
}

</mosaic_0001>

<bundles_post_ra>
// kernel: tpu_custom_call.1
= control target key start
LH: loop header
LB: loop body
LE: loop exit
PB: predicated region body
PF: predicated region fallthrough
CT: control target
= control target key end

     0   :  { %8 = vsyncpa [#allocation5], 0  ;;  %s335_s0 = inlined_call_operand.hbm [shape: f32[16,32], index: 0, kind: input, shape index: {}]   ;;  %s336_s1 = inlined_call_operand.hbm [shape: f32[16,32], index: 1, kind: input, shape index: {}]   ;;  %s337_s2 = inlined_call_operand.hbm [shape: f32[16,32], index: 2, kind: input, shape index: {}]   ;;  %s338_s3 = inlined_call_operand.vmem [shape: f32[16,1], index: 3, kind: output, shape index: {}]  }
   0x1   :  { %9 = vsyncpa [#allocation7], 0  ;;  %s241_s12 = smov [#allocation6]   ;;  %s242_s14 = smov [#allocation4]  }
   0x2   :  { %s27_s13 = sshll.u32 %s241_s12, 4  ;;  %s15_s15 = sshll.u32 %s242_s14, 4  ;;  %s28_s13 = int_to_ptr.vmem [resolvable:$true] %s27_s13  ;;  %s267_s15 = int_to_ptr.vmem [resolvable:$true] %s15_s15 }
   0x3   :  { %s171_s18 = scalar_lea.hbm %s336_s1, 256 }
   0x4   :  { %p172_p0 = scmp.ne.s32.totalorder %s336_s1, %s171_s18  ;;  %p175_p1 = scmp.lt.u32.totalorder %s171_s18, %s336_s1 }
   0x6   :  { %p177_p2 = pnand %p175_p1, %p172_p0 }
   0x8   :  { %180 = shalt.err (!%p177_p2)
}
   0x9   :  { %s181_s23 = scalar_lea.vmem %s28_s13, 256  ;;  %p186_p4 = scmp.lt.s32.totalorder %s28_s13, %s28_s13 }
   0xa   :  { %p182_p3 = scmp.ne.s32.totalorder %s28_s13, %s181_s23  ;;  %p187_p5 = scmp.lt.s32.totalorder %s181_s23, %s181_s23 }
   0xc   :  { %p188_p6 = por %p187_p5, %p186_p4 }
   0xe   :  { %p189_p7 = pnand %p188_p6, %p182_p3 }
  0x10   :  { %192 = shalt.err (!%p189_p7)
}
  0x11   :  { %s243_s24 = smov 128   ;;  %s244_s25 = smov 8  }
  0x12   :  { %33 = dma.hbm_to_vmem [thread:$0]  %s336_s1, 256, %s28_s13, [#allocation7], %s243_s24, %s243_s24, %s244_s25  }
  0x13   :  { %s193_s30 = scalar_lea.hbm %s335_s0, 256 }
  0x14   :  { %p194_p8 = scmp.ne.s32.totalorder %s335_s0, %s193_s30  ;;  %p197_p9 = scmp.lt.u32.totalorder %s193_s30, %s335_s0 }
  0x16   :  { %p199_p10 = pnand %p197_p9, %p194_p8 }
  0x18   :  { %202 = shalt.err (!%p199_p10)
}
  0x19   :  { %s203_s8 = scalar_lea.vmem %s267_s15, 256  ;;  %p208_p12 = scmp.lt.s32.totalorder %s267_s15, %s267_s15 }
  0x1a   :  { %p204_p11 = scmp.ne.s32.totalorder %s267_s15, %s203_s8  ;;  %p209_p13 = scmp.lt.s32.totalorder %s203_s8, %s203_s8 }
  0x1c   :  { %p210_p0 = por %p209_p13, %p208_p12 }
  0x1e   :  { %p211_p1 = pnand %p210_p0, %p204_p11 }
  0x20   :  { %214 = shalt.err (!%p211_p1)
}
  0x21   :  { %21 = dma.hbm_to_vmem [thread:$0]  %s335_s0, 256, %s267_s15, [#allocation5], %s243_s24, %s243_s24, %s244_s25  }
  0x22   :  { %s245_s10 = smov [#allocation8]   ;;  %s215_s14 = scalar_lea.hbm %s337_s2, 256 }
  0x23   :  { %s39_s11 = sshll.u32 %s245_s10, 4  ;;  %p216_p2 = scmp.ne.s32.totalorder %s337_s2, %s215_s14  ;;  %s40_s11 = int_to_ptr.vmem [resolvable:$true] %s39_s11 }
  0x24   :  { %p219_p3 = scmp.lt.u32.totalorder %s215_s14, %s337_s2 }
  0x26   :  { %p221_p4 = pnand %p219_p3, %p216_p2 }
  0x28   :  { %224 = shalt.err (!%p221_p4)
}
  0x29   :  { %s225_s20 = scalar_lea.vmem %s40_s11, 256  ;;  %p230_p6 = scmp.lt.s32.totalorder %s40_s11, %s40_s11 }
  0x2a   :  { %p226_p5 = scmp.ne.s32.totalorder %s40_s11, %s225_s20  ;;  %p231_p7 = scmp.lt.s32.totalorder %s225_s20, %s225_s20 }
  0x2c   :  { %p232_p8 = por %p231_p7, %p230_p6 }
  0x2e   :  { %p233_p9 = pnand %p232_p8, %p226_p5 }
  0x30   :  { %236 = shalt.err (!%p233_p9)
}
  0x31   :  { %45 = dma.hbm_to_vmem [thread:$0]  %s337_s2, 256, %s40_s11, [#allocation7], %s243_s24, %s243_s24, %s244_s25  }
  0x32   :  { %237 = dma.done.wait [#allocation5], 256  }
  0x33   :  { %238 = vsyncadd [#allocation5], 4294967040 }
  0x34   :  { %239 = dma.done.wait [#allocation7], 512  }
  0x35   :  { %240 = vsyncadd [#allocation7], 4294966784  ;;  %vm90_vm0 = vcmask 7168   ;;  %v246_v0 = vmov 0.0   ;;  %v55_v1 = vld [vmem:[#allocation4] sm:$0xff]  ;;  %v57_v3 = vld [vmem:[#allocation6] sm:$0xff] }
  0x36   :  { %93 = vst.msk [vmem:[#allocation3] sm:$0xff] %vm90_vm0, %v246_v0  ;;  %91 = vst.msk [vmem:[#allocation2] sm:$0xff] %vm90_vm0, %v246_v0  ;;  %v59_v2 = vld [vmem:[#allocation8] sm:$0xff]  ;;  %v61_v5 = vsub.f32 %v55_v1, %v57_v3  ;;  %v56_v6 = vld [vmem:[#allocation4 + $0x8] sm:$0xff]  ;;  %vm71_vm1 = vcmask 261120  }
  0x37   :  { %92 = vst.msk [vmem:[#allocation2 + $0x8] sm:$0xff] %vm90_vm0, %v246_v0  ;;  %94 = vst.msk [vmem:[#allocation3 + $0x8] sm:$0xff] %vm90_vm0, %v246_v0  ;;  %v65_v4 = vsub.f32 %v55_v1, %v59_v2  ;;  %v60_v7 = vld [vmem:[#allocation8 + $0x8] sm:$0xff]  ;;  %v58_v8 = vld [vmem:[#allocation6 + $0x8] sm:$0xff] }
  0x38   :  { %v66_v9 = vsub.f32 %v56_v6, %v60_v7  ;;  %v62_v10 = vsub.f32 %v56_v6, %v58_v8  ;;  %v63_v12 = vadd.f32 1e-06, %v61_v5 }
  0x39   :  { %v67_v11 = vadd.f32 1e-06, %v65_v4 }
  0x3a   :  { %v68_v13 = vadd.f32 1e-06, %v66_v9  ;;  %v64_v14 = vadd.f32 1e-06, %v62_v10  ;;  %v69_v16 = vmul.f32 %v63_v12, %v63_v12 }
  0x3b   :  { %v78_v15 = vmul.f32 %v67_v11, %v67_v11 }
  0x3c   :  { %v79_v17 = vmul.f32 %v68_v13, %v68_v13  ;;  %v70_v18 = vmul.f32 %v64_v14, %v64_v14  ;;  %v72_v20 = vsel %vm71_vm1, %v69_v16, 0.0 }
  0x3d   :  { %v80_v19 = vsel %vm71_vm1, %v78_v15, 0.0  ;;  %73 = vadd.xlane.f32.xlu0 %v72_v20  ;;  %v102_v23 = vld [vmem:[#allocation3] sm:$0xff]  ;;  %v95_v24 = vld [vmem:[#allocation2] sm:$0xff] }
  0x3e   :  { %81 = vadd.xlane.f32.xlu1 %v80_v19  ;;  %v83_v21 = vsel %vm71_vm1, %v79_v17, 0.0  ;;  %v75_v22 = vsel %vm71_vm1, %v70_v18, 0.0  ;;  %v103_v29 = vld [vmem:[#allocation3 + $0x8] sm:$0xff]  ;;  %v96_v30 = vld [vmem:[#allocation2 + $0x8] sm:$0xff] }
  0x41   :  { %76 = vadd.xlane.f32.xlu0 %v75_v22 }
  0x42   :  { %84 = vadd.xlane.f32.xlu1 %v83_v21 }
  0xca   :  { %v74_v26 = vpop.xlane.xlu0 %73 }
  0xcb   :  { %v82_v25 = vpop.xlane.xlu1 %81  ;;  %v97_v28 = vadd.f32 %v95_v24, %v74_v26 }
  0xcc   :  { %v104_v27 = vadd.f32 %v102_v23, %v82_v25 }
  0xcd   :  { %100 = vst.msk [vmem:[#allocation2] sm:$0xff] %vm90_vm0, %v97_v28 }
  0xce   :  { %106 = vst.msk [vmem:[#allocation3] sm:$0xff] %vm90_vm0, %v104_v27  ;;  %v77_v32 = vpop.xlane.xlu0 %76 }
  0xcf   :  { %v85_v31 = vpop.xlane.xlu1 %84  ;;  %v98_v34 = vadd.f32 %v96_v30, %v77_v32 }
  0xd0   :  { %v105_v33 = vadd.f32 %v103_v29, %v85_v31 }
  0xd1   :  { %101 = vst.msk [vmem:[#allocation2 + $0x8] sm:$0xff] %vm90_vm0, %v98_v34 }
  0xd2   :  { %107 = vst.msk [vmem:[#allocation3 + $0x8] sm:$0xff] %vm90_vm0, %v105_v33 }
  0xd4   :  { %v111_v36 = vld [vmem:[#allocation2] sm:$0xff] }
  0xd5   :  { %v127_v35 = vld [vmem:[#allocation3] sm:$0xff]  ;;  %vm115_vm4 = vcmp.eq.f32.partialorder %v111_v36, inf  ;;  %v118_v45 = vand.u32 2147483648, %v111_v36  ;;  %vm117_vm5 = vcmp.eq.f32.partialorder %v111_v36, 0.0 }
  0xd6   :  { %163 = vrsqrt.f32 %v127_v35  ;;  %vm131_vm2 = vcmp.eq.f32.partialorder %v127_v35, inf  ;;  %v134_v42 = vand.u32 2147483648, %v127_v35  ;;  %vm133_vm3 = vcmp.eq.f32.partialorder %v127_v35, 0.0 }
  0xd7   :  { %165 = vrsqrt.f32 %v111_v36 }
  0xd8   :  { %v112_v38 = vld [vmem:[#allocation2 + $0x8] sm:$0xff] }
  0xd9   :  { %v128_v37 = vld [vmem:[#allocation3 + $0x8] sm:$0xff]  ;;  %vm122_vm8 = vcmp.eq.f32.partialorder %v112_v38, inf  ;;  %v125_v56 = vand.u32 2147483648, %v112_v38  ;;  %vm124_vm9 = vcmp.eq.f32.partialorder %v112_v38, 0.0 }
  0xda   :  { %167 = vrsqrt.f32 %v128_v37  ;;  %vm138_vm6 = vcmp.eq.f32.partialorder %v128_v37, inf  ;;  %v141_v53 = vand.u32 2147483648, %v128_v37  ;;  %vm140_vm7 = vcmp.eq.f32.partialorder %v128_v37, 0.0 }
  0xdb   :  { %169 = vrsqrt.f32 %v112_v38 }
  0xe0   :  { %v164_v39 = vpop.eup %163 }
  0xe1   :  { %v166_v40 = vpop.eup %165  ;;  %v130_v41 = vmul.f32 %v164_v39, %v127_v35 }
  0xe2   :  { %v114_v43 = vmul.f32 %v166_v40, %v111_v36 }
  0xe3   :  { %v132_v44 = vsel %vm131_vm2, %v127_v35, %v130_v41 }
  0xe4   :  { %v168_v46 = vpop.eup %167  ;;  %v135_v47 = vsel %vm133_vm3, %v134_v42, %v132_v44  ;;  %v116_v48 = vsel %vm115_vm4, %v111_v36, %v114_v43 }
  0xe5   :  { %v170_v49 = vpop.eup %169  ;;  %v119_v50 = vsel %vm117_vm5, %v118_v45, %v116_v48  ;;  %v137_v51 = vmul.f32 %v168_v46, %v128_v37 }
  0xe6   :  { %v143_v52 = vsub.f32 %v119_v50, %v135_v47  ;;  %v121_v54 = vmul.f32 %v170_v49, %v112_v38 }
  0xe7   :  { %v139_v55 = vsel %vm138_vm6, %v128_v37, %v137_v51 }
  0xe8   :  { %v145_v57 = vadd.f32 0.5, %v143_v52  ;;  %v142_v58 = vsel %vm140_vm7, %v141_v53, %v139_v55  ;;  %v123_v59 = vsel %vm122_vm8, %v112_v38, %v121_v54 }
  0xe9   :  { %v126_v60 = vsel %vm124_vm9, %v125_v56, %v123_v59 }
  0xea   :  { %v147_v61 = vmax.f32 %v145_v57, 0.0  ;;  %v144_v62 = vsub.f32 %v126_v60, %v142_v58 }
  0xec   :  { %149 = vst.msk [vmem:[%s338_s3] sm:$0xff] %vm90_vm0, %v147_v61  ;;  %v146_v63 = vadd.f32 0.5, %v144_v62 }
  0xee   :  { %v148_v0 = vmax.f32 %v146_v63, 0.0 }
  0xf0   :  { %150 = vst.msk [vmem:[%s338_s3 + $0x8] sm:$0xff] %vm90_vm0, %v148_v0 }
  0xf1   :  { %155 = vsyncpa [#allocation5], 1 }
  0xf2   :  { %156 = vsyncpa [#allocation7], 1 }

</bundles_post_ra>
